<compile_context>
chip_gen: v6e
topology: v6e:2x2x1
jax: 0.10.0
libtpu: 0.0.40
codegen_flags: <defaults>
</compile_context>

<pallas_src>
import functools

import jax
import jax.numpy as jnp
import numpy as np
from jax.experimental import pallas as pl
from jax.experimental.pallas import tpu as pltpu


def _as_pair(v):
    if isinstance(v, (tuple, list)):
        return (int(v[0]), int(v[1]))
    return (int(v), int(v))


def _pick_row_tile(Ho):
    """Largest row-tile that divides Ho and gives >= 2 grid steps."""
    for th in (32, 16, 8, 7, 5, 4, 3, 2):
        if Ho % th == 0 and Ho // th >= 2:
            return th
    return Ho


def _incept_conv_kernel(x_ref, w_ref, b_ref, o_ref, *, KH, KW, SH, SW, TH, Wo):
    """Fused conv + folded-BN + ReLU for one (batch, row-tile) grid step.

    x_ref : (Hp, Wp, Cin)        bf16 padded input (whole image, VMEM resident)
    w_ref : (KH*KW*Cin, Cout)    bf16 weights with BN scale folded in
    b_ref : (1, Cout)            f32 folded BN bias
    o_ref : (TH, Wo, Cout)       output row tile
    """
    Cin = x_ref.shape[-1]
    Cout = o_ref.shape[-1]

    r = pl.program_id(1)
    row_step = TH * SH
    row0 = r * row_step
    if row_step % 8 == 0:
        row0 = pl.multiple_of(row0, row_step)

    rows_span = SH * (TH - 1) + 1
    cols_span = SW * (Wo - 1) + 1

    # im2col: pack the KH*KW shifted windows along the channel axis so the MXU
    # sees one contraction of size KH*KW*Cin instead of KH*KW tiny ones.
    parts = []
    for kh in range(KH):
        for kw in range(KW):
            win = x_ref[pl.ds(row0 + kh, rows_span), pl.ds(kw, cols_span), :]
            if SH > 1 or SW > 1:
                win = win[::SH, ::SW, :]          # static strided in-register slice
            parts.append(win)                      # (TH, Wo, Cin) bf16
    patch = parts[0] if len(parts) == 1 else jnp.concatenate(parts, axis=-1)

    acc = jnp.dot(patch.reshape(TH * Wo, KH * KW * Cin), w_ref[...],
                  preferred_element_type=jnp.float32)          # (TH*Wo, Cout) f32

    y = jnp.maximum(acc + b_ref[0], 0.0)                       # +bias, ReLU in f32
    o_ref[...] = y.reshape(TH, Wo, Cout).astype(o_ref.dtype)


def fold_incept_conv_params(w_oihw, gamma, beta, running_mean, running_var,
                            eps=1e-3):
    """Fold BN (inference) into the conv weights.

    Returns (w_packed, bias):
      w_packed : (KH*KW*Cin, Cout) bf16,  w' = w * gamma / sqrt(var + eps)
      bias     : (Cout,) f32,             beta - mean * scale
    Packing order (kh, kw, cin) matches the kernel's im2col concatenation.
    """
    Cout, Cin, KH, KW = w_oihw.shape
    scale = gamma / jnp.sqrt(running_var + eps)
    bias = beta - running_mean * scale
    w_hwio = jnp.transpose(w_oihw, (2, 3, 1, 0)) * scale[None, None, None, :]
    w_packed = w_hwio.reshape(KH * KW * Cin, Cout).astype(jnp.bfloat16)
    return w_packed, bias.astype(jnp.float32)


def incept_conv(x_nchw, w_packed, bias, *, kernel_size, stride=1, padding=0):
    """InceptConv forward: conv(bias=False) + folded BN + ReLU. NCHW in/out."""
    KH, KW = _as_pair(kernel_size)
    SH, SW = _as_pair(stride)
    PH, PW = _as_pair(padding)

    N, Cin, H, W = x_nchw.shape
    K, Cout = w_packed.shape
    assert K == KH * KW * Cin, (K, KH, KW, Cin)

    # NCHW -> NHWC, bf16 activations (halves DMA bytes, feeds the bf16 MXU).
    x = jnp.transpose(x_nchw, (0, 2, 3, 1)).astype(jnp.bfloat16)
    xp = jnp.pad(x, ((0, 0), (PH, PH), (PW, PW), (0, 0)))
    Hp, Wp = H + 2 * PH, W + 2 * PW
    Ho = (Hp - KH) // SH + 1
    Wo = (Wp - KW) // SW + 1
    TH = _pick_row_tile(Ho)

    kernel = functools.partial(_incept_conv_kernel,
                               KH=KH, KW=KW, SH=SH, SW=SW, TH=TH, Wo=Wo)

    y = pl.pallas_call(
        kernel,
        out_shape=jax.ShapeDtypeStruct((N, Ho, Wo, Cout), x_nchw.dtype),
        grid_spec=pltpu.PrefetchScalarGridSpec(
            num_scalar_prefetch=0,
            grid=(N, Ho // TH),
            in_specs=[
                # Whole padded image per batch element; block index does not
                # depend on the row-tile axis -> stays VMEM resident across r.
                pl.BlockSpec((None, Hp, Wp, Cin), lambda n, r: (n, 0, 0, 0)),
                pl.BlockSpec((K, Cout), lambda n, r: (0, 0)),
                pl.BlockSpec((1, Cout), lambda n, r: (0, 0)),
            ],
            out_specs=pl.BlockSpec((None, TH, Wo, Cout),
                                   lambda n, r: (n, r, 0, 0)),
        ),
        compiler_params=pltpu.CompilerParams(
            dimension_semantics=("parallel", "parallel"),
            vmem_limit_bytes=32 * 1024 * 1024),
    )(xp, w_packed, bias.reshape(1, Cout))

    return jnp.transpose(y, (0, 3, 1, 2))  # NHWC -> NCHW


# ---------------------------------------------------------------------------
# Pure-JAX (f32) reference for correctness checking.
# ---------------------------------------------------------------------------
def _ref_incept_conv(x_nchw, w_oihw, gamma, beta, mean, var, stride, padding,
                     eps=1e-3):
    SH, SW = _as_pair(stride)
    PH, PW = _as_pair(padding)
    y = jax.lax.conv_general_dilated(
        x_nchw, w_oihw, window_strides=(SH, SW),
        padding=((PH, PH), (PW, PW)),
        dimension_numbers=("NCHW", "OIHW", "NCHW"))
    scale = gamma / jnp.sqrt(var + eps)
    bias = beta - mean * scale
    y = y * scale[None, :, None, None] + bias[None, :, None, None]
    return jnp.maximum(y, 0.0)


if __name__ == "__main__":
    key = jax.random.PRNGKey(0)
    N, H, W = 2, 16, 16

    configs = [
        # (in_ch, out_ch, kernel_size, stride, padding)
        dict(in_ch=4, out_ch=32, kernel_size=3,      stride=1, padding=1),
        dict(in_ch=4, out_ch=32, kernel_size=(1, 3), stride=1, padding=(0, 1)),
        dict(in_ch=4, out_ch=32, kernel_size=3,      stride=2, padding=0),
        dict(in_ch=4, out_ch=32, kernel_size=1,      stride=1, padding=0),
    ]

    for i, cfg in enumerate(configs):
        k = jax.random.fold_in(key, i)
        kx, kw, kg, kb, km, kv = jax.random.split(k, 6)
        KH, KW = _as_pair(cfg["kernel_size"])

        x = jax.random.normal(kx, (N, cfg["in_ch"], H, W), jnp.float32)
        w = 0.1 * jax.random.normal(
            kw, (cfg["out_ch"], cfg["in_ch"], KH, KW), jnp.float32)
        gamma = 1.0 + 0.1 * jax.random.normal(kg, (cfg["out_ch"],), jnp.float32)
        beta = 0.1 * jax.random.normal(kb, (cfg["out_ch"],), jnp.float32)
        mean = 0.1 * jax.random.normal(km, (cfg["out_ch"],), jnp.float32)
        var = jnp.abs(jax.random.normal(kv, (cfg["out_ch"],), jnp.float32)) + 0.5

        w_packed, bias = fold_incept_conv_params(w, gamma, beta, mean, var)

        out = incept_conv(x, w_packed, bias,
                          kernel_size=cfg["kernel_size"],
                          stride=cfg["stride"], padding=cfg["padding"])
        out = jax.block_until_ready(out)

        ref = _ref_incept_conv(x, w, gamma, beta, mean, var,
                               cfg["stride"], cfg["padding"])
        ref = jax.block_until_ready(ref)

        assert out.shape == ref.shape, (out.shape, ref.shape)
        # bf16 MXU inputs + f32 accumulation -> slightly looser tolerance.
        np.testing.assert_allclose(np.asarray(out), np.asarray(ref),
                                   rtol=3e-2, atol=3e-2)

    print("KERNEL_OK")
</pallas_src>

<mosaic_0001>
module attributes {stable_mosaic.version = 11 : i64} {
  func.func @_incept_conv_kernel(%arg0: i32, %arg1: i32, %arg2: memref<1x18x18x4xbf16, #tpu.memory_space<vmem>>, %arg3: memref<36x32xbf16, #tpu.memory_space<vmem>>, %arg4: memref<1x32xf32, #tpu.memory_space<vmem>>, %arg5: memref<1x8x16x32xf32, #tpu.memory_space<vmem>>) attributes {dimension_semantics = [#tpu.dimension_semantics<parallel>, #tpu.dimension_semantics<parallel>], iteration_bounds = array<i64: 2, 2>, scalar_prefetch = 0 : i64, scratch_operands = 0 : i64, tpu.core_type = #tpu.core_type<tc>, window_params = [{transform_indices = @transform_0, window_bounds = array<i64: 1, 18, 18, 4>}, {pipeline_mode = #tpu.pipeline_mode<synchronous>, transform_indices = @transform_1, window_bounds = array<i64: 36, 32>}, {pipeline_mode = #tpu.pipeline_mode<synchronous>, transform_indices = @transform_2, window_bounds = array<i64: 1, 32>}, {transform_indices = @transform_3, window_bounds = array<i64: 1, 8, 16, 32>}]} {
    %c8_i32 = arith.constant 8 : i32
    %0 = arith.muli %arg1, %c8_i32 : i32
    %1 = tpu.assume_multiple %0, 8 : i32
    %c0_i32 = arith.constant 0 : i32
    %2 = arith.addi %1, %c0_i32 : i32
    %c0 = arith.constant 0 : index
    %3 = arith.index_cast %2 : i32 to index
    %c0_0 = arith.constant 0 : index
    %c0_1 = arith.constant 0 : index
    %4 = vector.load %arg2[%c0, %3, %c0_0, %c0_1] : memref<1x18x18x4xbf16, #tpu.memory_space<vmem>>, vector<1x8x16x4xbf16>
    %5 = vector.shape_cast %4 : vector<1x8x16x4xbf16> to vector<8x16x4xbf16>
    %c0_i32_2 = arith.constant 0 : i32
    %6 = arith.addi %1, %c0_i32_2 : i32
    %c0_3 = arith.constant 0 : index
    %7 = arith.index_cast %6 : i32 to index
    %c1 = arith.constant 1 : index
    %c0_4 = arith.constant 0 : index
    %8 = vector.load %arg2[%c0_3, %7, %c1, %c0_4] : memref<1x18x18x4xbf16, #tpu.memory_space<vmem>>, vector<1x8x16x4xbf16>
    %9 = vector.shape_cast %8 : vector<1x8x16x4xbf16> to vector<8x16x4xbf16>
    %c0_i32_5 = arith.constant 0 : i32
    %10 = arith.addi %1, %c0_i32_5 : i32
    %c0_6 = arith.constant 0 : index
    %11 = arith.index_cast %10 : i32 to index
    %c2 = arith.constant 2 : index
    %c0_7 = arith.constant 0 : index
    %12 = vector.load %arg2[%c0_6, %11, %c2, %c0_7] : memref<1x18x18x4xbf16, #tpu.memory_space<vmem>>, vector<1x8x16x4xbf16>
    %13 = vector.shape_cast %12 : vector<1x8x16x4xbf16> to vector<8x16x4xbf16>
    %c1_i32 = arith.constant 1 : i32
    %14 = arith.addi %1, %c1_i32 : i32
    %c0_8 = arith.constant 0 : index
    %15 = arith.index_cast %14 : i32 to index
    %c0_9 = arith.constant 0 : index
    %c0_10 = arith.constant 0 : index
    %16 = vector.load %arg2[%c0_8, %15, %c0_9, %c0_10] : memref<1x18x18x4xbf16, #tpu.memory_space<vmem>>, vector<1x8x16x4xbf16>
    %17 = vector.shape_cast %16 : vector<1x8x16x4xbf16> to vector<8x16x4xbf16>
    %c1_i32_11 = arith.constant 1 : i32
    %18 = arith.addi %1, %c1_i32_11 : i32
    %c0_12 = arith.constant 0 : index
    %19 = arith.index_cast %18 : i32 to index
    %c1_13 = arith.constant 1 : index
    %c0_14 = arith.constant 0 : index
    %20 = vector.load %arg2[%c0_12, %19, %c1_13, %c0_14] : memref<1x18x18x4xbf16, #tpu.memory_space<vmem>>, vector<1x8x16x4xbf16>
    %21 = vector.shape_cast %20 : vector<1x8x16x4xbf16> to vector<8x16x4xbf16>
    %c1_i32_15 = arith.constant 1 : i32
    %22 = arith.addi %1, %c1_i32_15 : i32
    %c0_16 = arith.constant 0 : index
    %23 = arith.index_cast %22 : i32 to index
    %c2_17 = arith.constant 2 : index
    %c0_18 = arith.constant 0 : index
    %24 = vector.load %arg2[%c0_16, %23, %c2_17, %c0_18] : memref<1x18x18x4xbf16, #tpu.memory_space<vmem>>, vector<1x8x16x4xbf16>
    %25 = vector.shape_cast %24 : vector<1x8x16x4xbf16> to vector<8x16x4xbf16>
    %c2_i32 = arith.constant 2 : i32
    %26 = arith.addi %1, %c2_i32 : i32
    %c0_19 = arith.constant 0 : index
    %27 = arith.index_cast %26 : i32 to index
    %c0_20 = arith.constant 0 : index
    %c0_21 = arith.constant 0 : index
    %28 = vector.load %arg2[%c0_19, %27, %c0_20, %c0_21] : memref<1x18x18x4xbf16, #tpu.memory_space<vmem>>, vector<1x8x16x4xbf16>
    %29 = vector.shape_cast %28 : vector<1x8x16x4xbf16> to vector<8x16x4xbf16>
    %c2_i32_22 = arith.constant 2 : i32
    %30 = arith.addi %1, %c2_i32_22 : i32
    %c0_23 = arith.constant 0 : index
    %31 = arith.index_cast %30 : i32 to index
    %c1_24 = arith.constant 1 : index
    %c0_25 = arith.constant 0 : index
    %32 = vector.load %arg2[%c0_23, %31, %c1_24, %c0_25] : memref<1x18x18x4xbf16, #tpu.memory_space<vmem>>, vector<1x8x16x4xbf16>
    %33 = vector.shape_cast %32 : vector<1x8x16x4xbf16> to vector<8x16x4xbf16>
    %c2_i32_26 = arith.constant 2 : i32
    %34 = arith.addi %1, %c2_i32_26 : i32
    %c0_27 = arith.constant 0 : index
    %35 = arith.index_cast %34 : i32 to index
    %c2_28 = arith.constant 2 : index
    %c0_29 = arith.constant 0 : index
    %36 = vector.load %arg2[%c0_27, %35, %c2_28, %c0_29] : memref<1x18x18x4xbf16, #tpu.memory_space<vmem>>, vector<1x8x16x4xbf16>
    %37 = vector.shape_cast %36 : vector<1x8x16x4xbf16> to vector<8x16x4xbf16>
    %38 = tpu.concatenate %5, %9, %13, %17, %21, %25, %29, %33, %37 in 2 : vector<8x16x4xbf16>, vector<8x16x4xbf16>, vector<8x16x4xbf16>, vector<8x16x4xbf16>, vector<8x16x4xbf16>, vector<8x16x4xbf16>, vector<8x16x4xbf16>, vector<8x16x4xbf16>, vector<8x16x4xbf16> -> vector<8x16x36xbf16>
    %39 = vector.shape_cast %38 : vector<8x16x36xbf16> to vector<128x36xbf16>
    %c0_30 = arith.constant 0 : index
    %c0_31 = arith.constant 0 : index
    %40 = vector.load %arg3[%c0_30, %c0_31] : memref<36x32xbf16, #tpu.memory_space<vmem>>, vector<36x32xbf16>
    %cst = arith.constant dense<0.000000e+00> : vector<128x32xf32>
    %41 = tpu.matmul %39, %40, %cst {dimension_numbers = #tpu.dot_dimension_numbers<[1], [0], [0], [1], [0, 0, 1, 1], [], []>} : vector<128x36xbf16>, vector<36x32xbf16>, vector<128x32xf32> -> vector<128x32xf32>
    %c0_32 = arith.constant 0 : index
    %c0_33 = arith.constant 0 : index
    %42 = vector.load %arg4[%c0_32, %c0_33] : memref<1x32xf32, #tpu.memory_space<vmem>>, vector<1x32xf32>
    %43 = vector.shape_cast %42 : vector<1x32xf32> to vector<32xf32>
    %44 = vector.shape_cast %43 : vector<32xf32> to vector<1x32xf32>
    %45 = vector.broadcast %44 : vector<1x32xf32> to vector<128x32xf32>
    %46 = arith.addf %41, %45 : vector<128x32xf32>
    %cst_34 = arith.constant 0.000000e+00 : f32
    %47 = vector.broadcast %cst_34 : f32 to vector<128x32xf32>
    %48 = arith.maximumf %46, %47 : vector<128x32xf32>
    %49 = vector.shape_cast %48 : vector<128x32xf32> to vector<8x16x32xf32>
    %c0_35 = arith.constant 0 : index
    %c0_36 = arith.constant 0 : index
    %c0_37 = arith.constant 0 : index
    %c0_38 = arith.constant 0 : index
    %50 = vector.load %arg5[%c0_35, %c0_36, %c0_37, %c0_38] : memref<1x8x16x32xf32, #tpu.memory_space<vmem>>, vector<1x8x16x32xf32>
    %51 = vector.shape_cast %50 : vector<1x8x16x32xf32> to vector<8x16x32xf32>
    %52 = vector.shape_cast %49 : vector<8x16x32xf32> to vector<1x8x16x32xf32>
    tpu.vector_store %arg5[%c0_35, %c0_36, %c0_37, %c0_38], %52 {strides = array<i32>} : memref<1x8x16x32xf32, #tpu.memory_space<vmem>>, vector<1x8x16x32xf32>,
    return
  }
  func.func @transform_0(%arg0: i32, %arg1: i32) -> (i32, i32, i32, i32) {
    %c0_i32 = arith.constant 0 : i32
    %c0_i32_0 = arith.constant 0 : i32
    %c0_i32_1 = arith.constant 0 : i32
    %c0_i32_2 = arith.constant 0 : i32
    return %arg0, %c0_i32, %c0_i32_0, %c0_i32_1 : i32, i32, i32, i32
  }
  func.func @transform_1(%arg0: i32, %arg1: i32) -> (i32, i32) {
    %c0_i32 = arith.constant 0 : i32
    %c0_i32_0 = arith.constant 0 : i32
    %c0_i32_1 = arith.constant 0 : i32
    return %c0_i32, %c0_i32_0 : i32, i32
  }
  func.func @transform_2(%arg0: i32, %arg1: i32) -> (i32, i32) {
    %c0_i32 = arith.constant 0 : i32
    %c0_i32_0 = arith.constant 0 : i32
    %c0_i32_1 = arith.constant 0 : i32
    return %c0_i32, %c0_i32_0 : i32, i32
  }
  func.func @transform_3(%arg0: i32, %arg1: i32) -> (i32, i32, i32, i32) {
    %c0_i32 = arith.constant 0 : i32
    %c0_i32_0 = arith.constant 0 : i32
    %c0_i32_1 = arith.constant 0 : i32
    return %arg0, %arg1, %c0_i32, %c0_i32_0 : i32, i32, i32, i32
  }
}

</mosaic_0001>

<bundles_post_ra>
// kernel: tpu_custom_call.1
= control target key start
LH: loop header
LB: loop body
LE: loop exit
PB: predicated region body
PF: predicated region fallthrough
CT: control target
= control target key end

     0   :  { %8 = vsyncpa [#allocation3], 0  ;;  %s2650_s0 = inlined_call_operand.vmem [shape: bf16[2,18,18,4], index: 0, kind: input, shape index: {}]   ;;  %s2651_s1 = inlined_call_operand.vmem [shape: bf16[36,32], index: 1, kind: input, shape index: {}]   ;;  %s2652_s2 = inlined_call_operand.vmem [shape: f32[1,32], index: 2, kind: input, shape index: {}]   ;;  %s2653_s3 = inlined_call_operand.hbm [shape: f32[2,16,16,32], index: 3, kind: output, shape index: {}]  }
   0x1   :  { %10 = vsyncpa [#allocation3 + $0x1], 0  ;;  %s1955_s12 = smov 0   ;;  %s1957_s13 = smov 0  }
   0x2   :  { %s1959_s14 = smov 0   ;;  %s1961_s15 = smov 0  }
   0x3   :  { %s1963_s16 = smov 0   ;;  %s1965_s17 = smov 0  }
   0x4   :  { %s1967_s18 = smov 0   ;;  %s1969_s19 = smov 0  }
   0x5 LB: > { %s1463_s20 = sadd.s32 4294967295, %s1923_s19   ;;  %s1464_s21 = sadd.s32 4294967294, %s1923_s19   ;;  %s1923_s19 = sphi %s1969_s19, %s16_s19   ;;  %s1919_s18 = sphi %s1967_s18, %s2662_s18   ;;  %s1915_s17 = sphi %s1965_s17, %s2661_s17   ;;  %s1911_s16 = sphi %s1963_s16, %s2660_s16   ;;  %s1907_s15 = sphi %s1961_s15, %s2659_s15   ;;  %s1903_s14 = sphi %s1959_s14, %s2658_s14   ;;  %s1899_s13 = sphi %s1957_s13, %s2657_s13   ;;  %s1895_s12 = sphi %s1955_s12, %s2656_s12  }
   0x6   : > { %s25_s22 = sadd.s32 1, %s1915_s17  ;;  %s28_s23 = sadd.s32 1, %s1919_s18 }
   0x7   : > { %p26_p0 = scmp.ge.s32.totalorder %s25_s22, 2  ;;  %p115_p1 = scmp.ne.s32.totalorder %s1903_s14, %s1899_s13 }
   0x8   : > { %p116_p2 = scmp.eq.s32.totalorder %s1463_s20, 3  ;;  %p121_p5 = scmp.ne.s32.totalorder %s1899_s13, %s1895_s12 }
   0x9   : > { %s2664_s22 = smov (%p26_p0, %s25_s22), 0  ;;  %s2666_s23 = smov (!%p26_p0, %s28_s23), %s1919_s18 }
   0xa   : > { %s101_s24 = ssub.s32 %s1915_s17, %s2664_s22  ;;  %p2006_p3 = por %p116_p2, %p115_p1 }
   0xb   : > { %p30_p4 = scmp.ge.s32.totalorder %s2666_s23, 2  ;;  %p122_p6 = scmp.eq.s32.totalorder %s1464_s21, 3 }
   0xc   : > { %p1467_p7 = scmp.ge.s32.totalorder %s1923_s19, 1  ;;  %p154_p9 = scmp.lt.s32.totalorder %s1923_s19, 5 }
   0xd   : > { %s2668_s23 = smov (%p30_p4, %s2666_s23), 0  ;;  %p2015_p8 = por %p122_p6, %p121_p5 }
   0xe   : > { %s100_s27 = ssub.s32 %s1919_s18, %s2668_s23  ;;  %s105_s28 = sadd.s32 1, %s1903_s14 }
   0xf   : > { %s102_s29 = sor.u32 %s101_s24, %s100_s27  ;;  %p155_p10 = pnand %p1467_p7, %p154_p9 }
  0x10   : > { %p103_p11 = scmp.eq.s32.totalorder %s102_s29, 0  ;;  %p178_p12 = scmp.lt.s32.totalorder (!%p155_p10), %s1911_s16, 1 }
  0x11   : > { %158 = sbr.rel (%p155_p10) target bundleno = 491 (0x1eb), region = 32  ;;  %s1925_s11 = smov (!%p155_p10), 12  }
  0x12   : > { %s2024_s30 = scalar_select %p103_p11, %s1903_s14, %s105_s28  }
  0x13   : > { %s1632_s5 = smul.u32 (!%p155_p10), 96, %s1907_s15  ;;  %s1926_s20 = smov (!%p155_p10), 8  }
  0x14   : > { %s1927_s21 = smov (!%p155_p10), 4   ;;  %s1928_s24 = smov (!%p155_p10), 16  }
  0x15   : > { %s1929_s27 = smov (!%p155_p10), 20   ;;  %s1930_s28 = smov (!%p155_p10), 24  }
  0x16   : > { %s179_s4 = scalar_select %p178_p12, %s1911_s16, 1  ;;  %vm494_vm0 = vcmask 1046528   ;;  %vm357_vm1 = vsmask.f32 7424  ;;  %vm1227_vm2 = vcmask 1041408   ;;  %vm1047_vm3 = vcmask 31744  }
  0x17   : > { %s1931_s29 = smov 28   ;;  %vm1064_vm4 = vcmask 64512   ;;  %vm1081_vm5 = vcmask 97280   ;;  %vm1098_vm6 = vcmask 130048   ;;  %vm1115_vm7 = vcmask 162816  }
  0x18   : > { %s1675_s6 = smul.u32 216, %s179_s4  ;;  %s1932_s4 = smov 32   ;;  %vm1132_vm8 = vcmask 195584   ;;  %vm1149_vm9 = vcmask 228352   ;;  %vm1166_vm10 = vcmask 261120   ;;  %vm1210_vm11 = vcmask 293888  }
  0x1a   : > { %s182_s9 = scalar_lea.vmem %s2650_s0, %s1675_s6 }
  0x1b   : > { %s2032_s10 = scalar_lea.vmem %s182_s9, %s1632_s5 }
  0x1c   : > { %v1483_v0 = vld [vmem:[%s2032_s10 + $0x3c] sm:$0xf]  ;;  %v2036_v1 = vld [vmem:[%s2032_s10 + $0x40] sm:$0xf]  ;;  %v1475_v3 = vld [vmem:[%s2032_s10 + $0xc] sm:$0xf] }
  0x1d   : > { %v2039_v2 = vcombine.low %v1483_v0, %v2036_v1  ;;  %v2043_v4 = vld [vmem:[%s2032_s10 + $0x10] sm:$0xf]  ;;  %v198_v6 = vld [vmem:[%s2032_s10 + $0x34] sm:$0xf]  ;;  %v190_v12 = vld [vmem:[%s2032_s10 + $0x4] sm:$0xf] }
  0x1e   : > { %v2046_v5 = vcombine.low %v1475_v3, %v2043_v4  ;;  %v217_v7 = vld [vmem:[%s2032_s10 + $0x30] sm:$0xe]  ;;  %v2053_v8 = vld [vmem:[%s2032_s10 + $0x38] ss:$0 sps:$4 sm:$0x11]  }
  0x1f   : > { %583 = vrot.lane.b32.xlu1 %v2039_v2, %s1925_s11  ;;  %v1561_v9 = vcombine.low %v217_v7, %v198_v6  ;;  %v197_v10 = vld [vmem:[%s2032_s10 + $0x30] sm:$0xf]  ;;  %v666_v11 = vshll.u32 %v2039_v2, 16  ;;  %v508_v14 = vrot.slane %v2053_v8, 1  ;;  %v213_v15 = vld [vmem:[%s2032_s10] sm:$0xe] }
  0x20   : > { %575 = vrot.lane.b32.xlu0 %v2046_v5, %s1925_s11  ;;  %v189_v16 = vld [vmem:[%s2032_s10] sm:$0xf]  ;;  %v618_v17 = vshll.u32 %v2046_v5, 16  ;;  %v2064_v18 = vcombine.low %v197_v10, %v198_v6  ;;  %v1763_v19 = vld [vmem:[%s2032_s10 + $0x8] ss:$0 sps:$4 sm:$0x11]   ;;  %v1557_v20 = vcombine.low %v213_v15, %v190_v12 }
  0x21   : > { %v507_v13 = vrot.slane %v1561_v9, 1  ;;  %v199_v21 = vld [vmem:[%s2032_s10 + $0x3c] sm:$0xf]  ;;  %v2069_v23 = vcombine.low %v189_v16, %v190_v12  ;;  %v200_v24 = vld [vmem:[%s2032_s10 + $0x40] sm:$0xf]  ;;  %v496_v27 = vrot.slane %v1763_v19, 1 }
  0x22   : > { %v218_v25 = vld [vmem:[%s2032_s10 + $0x3c] sm:$0xe]  ;;  %v495_v26 = vrot.slane %v1557_v20, 1  ;;  %v1767_v28 = vld [vmem:[%s2032_s10 + $0x44] ss:$0 sps:$4 sm:$0x11]   ;;  %v2076_v31 = vcombine.low %v199_v21, %v200_v24 }
  0x23   : > { %v509_v22 = vsel %vm494_vm0, %v507_v13, %v508_v14  ;;  %v1562_v29 = vcombine.low %v218_v25, %v200_v24  ;;  %v407_v30 = vshrl.u32 %v2064_v18, 16  ;;  %v191_v32 = vld [vmem:[%s2032_s10 + $0xc] sm:$0xf]  ;;  %v192_v33 = vld [vmem:[%s2032_s10 + $0x10] sm:$0xf]  ;;  %v511_v36 = vrot.slane %v1767_v28, 1 }
  0x24   : > { %527 = vrot.lane.b32.xlu1 %v509_v22, %s1926_s20  ;;  %v497_v34 = vsel %vm494_vm0, %v495_v26, %v496_v27  ;;  %v214_v37 = vld [vmem:[%s2032_s10 + $0xc] sm:$0xe]  ;;  %v2082_v38 = vcombine.low %v191_v32, %v192_v33  ;;  %v1770_v39 = vld [vmem:[%s2032_s10 + $0x14] ss:$0 sps:$4 sm:$0x11]   ;;  %v359_v41 = vshrl.u32 %v2069_v23, 16 }
  0x25   : > { %v510_v35 = vrot.slane %v1562_v29, 1  ;;  %519 = vrot.lane.b32.xlu0 %v497_v34, %s1926_s20  ;;  %v1558_v40 = vcombine.low %v214_v37, %v192_v33  ;;  %v361_v42 = vshll.u32 %v2069_v23, 16  ;;  %v366_v43 = vshll.u32 %v1763_v19, 16  ;;  %v1485_v52 = vld [vmem:[%s2032_s10 + $0x48] sm:$0xf] }
  0x26   : > { %v371_v45 = vshrl.u32 %v2082_v38, 16  ;;  %v373_v46 = vshll.u32 %v2082_v38, 16  ;;  %v419_v47 = vshrl.u32 %v2076_v31, 16  ;;  %v499_v49 = vrot.slane %v1770_v39, 1  ;;  %v2096_v57 = vld [vmem:[%s2032_s10 + $0x4c] sm:$0xf] }
  0x27   : > { %v512_v44 = vsel %vm494_vm0, %v510_v35, %v511_v36  ;;  %v498_v48 = vrot.slane %v1558_v40, 1  ;;  %v378_v50 = vshll.u32 %v1770_v39, 16  ;;  %v363_v51 = vrot.slane %v361_v42, 1  ;;  %v1477_v62 = vld [vmem:[%s2032_s10 + $0x18] sm:$0xf] }
  0x28   : > { %529 = vrot.lane.b32.xlu1 %v512_v44, %s1926_s20  ;;  %v375_v53 = vrot.slane %v373_v46, 1  ;;  %v368_v54 = vrot.slane %v366_v43, 1  ;;  %v421_v55 = vshll.u32 %v2076_v31, 16  ;;  %v426_v56 = vshll.u32 %v1767_v28, 16  ;;  %v2102_v63 = vld [vmem:[%s2032_s10 + $0x1c] sm:$0xf] }
  0x29   : > { %v500_v58 = vsel %vm494_vm0, %v498_v48, %v499_v49  ;;  %v380_v59 = vrot.slane %v378_v50, 1  ;;  %v364_v60 = vor.u32 %v363_v51, %v359_v41  ;;  %v409_v61 = vshll.u32 %v2064_v18, 16  ;;  %v2109_v13 = vld [vmem:[%s2032_s10 + $0x44] ss:$0 sps:$4 sm:$0x11]  }
  0x2a   : > { %521 = vrot.lane.b32.xlu0 %v500_v58, %s1926_s20  ;;  %v376_v0 = vor.u32 %v375_v53, %v371_v45  ;;  %v423_v3 = vrot.slane %v421_v55, 1  ;;  %v428_v6 = vrot.slane %v426_v56, 1  ;;  %v414_v7 = vshll.u32 %v2053_v8, 16  ;;  %v2114_v20 = vld [vmem:[%s2032_s10 + $0x14] ss:$0 sps:$4 sm:$0x11]  }
  0x2b   : > { %v369_v9 = vsel %vm357_vm1, %v364_v60, %v368_v54  ;;  %v411_v10 = vrot.slane %v409_v61, 1  ;;  %v1570_v12 = vcombine.low %v1485_v52, %v2096_v57  ;;  %v1566_v19 = vcombine.low %v1477_v62, %v2102_v63  ;;  %v2121_v24 = vld [vmem:[%s2032_s10 + $0x50] ss:$0 sps:$4 sm:$0x11]   ;;  %v1503_v35 = vld [vmem:[%s2032_s10 + $0x3c] sm:$0xe] }
  0x2c   : > { %v381_v14 = vsel %vm357_vm1, %v376_v0, %v380_v59  ;;  %v424_v15 = vor.u32 %v423_v3, %v419_v47  ;;  %v416_v16 = vrot.slane %v414_v7, 1  ;;  %v664_v21 = vshrl.u32 %v2039_v2, 16  ;;  %v1499_v43 = vld [vmem:[%s2032_s10 + $0xc] sm:$0xe]  ;;  %v1504_v45 = vld [vmem:[%s2032_s10 + $0x48] sm:$0xe] }
  0x2d   : > { %456 = vrot.lane.b32.xlu1 %v381_v14, %s1927_s21  ;;  %v412_v8 = vor.u32 %v411_v10, %v407_v30  ;;  %v668_v22 = vrot.slane %v666_v11, 1  ;;  %v678_v26 = vshll.u32 %v1570_v12, 16  ;;  %v671_v27 = vshll.u32 %v2109_v13, 16  ;;  %v2132_v11 = vld [vmem:[%s2032_s10 + $0x20] ss:$0 sps:$4 sm:$0x11]  }
  0x2e   : > { %454 = vrot.lane.b32.xlu0 %v369_v9, %s1927_s21  ;;  %v429_v25 = vsel %vm357_vm1, %v424_v15, %v428_v6  ;;  %v616_v28 = vshrl.u32 %v2046_v5, 16  ;;  %v630_v30 = vshll.u32 %v1566_v19, 16  ;;  %v620_v32 = vrot.slane %v618_v17, 1  ;;  %v1500_v50 = vld [vmem:[%s2032_s10 + $0x18] sm:$0xe] }
  0x2f   : > { %v417_v29 = vsel %vm357_vm1, %v412_v8, %v416_v16  ;;  %v623_v2 = vshll.u32 %v2114_v20, 16  ;;  %v669_v33 = vor.u32 %v668_v22, %v664_v21  ;;  %v673_v34 = vrot.slane %v671_v27, 1  ;;  %v1517_v55 = vld [vmem:[%s2032_s10 + $0x48] sm:$0xf]  ;;  %v2152_v56 = vld [vmem:[%s2032_s10 + $0x4c] sm:$0xf] }
  0x30   : > { %v621_v36 = vor.u32 %v620_v32, %v616_v28  ;;  %v676_v37 = vshrl.u32 %v1570_v12, 16  ;;  %v680_v39 = vrot.slane %v678_v26, 1  ;;  %v683_v5 = vshll.u32 %v2121_v24, 16  ;;  %v1509_v3 = vld [vmem:[%s2032_s10 + $0x18] sm:$0xf] }
  0x31   : > { %464 = vrot.lane.b32.xlu1 %v429_v25, %s1927_s21  ;;  %v625_v17 = vrot.slane %v623_v2, 1  ;;  %v628_v40 = vshrl.u32 %v1566_v19, 16  ;;  %v632_v41 = vrot.slane %v630_v30, 1  ;;  %v635_v42 = vshll.u32 %v2132_v11, 16  ;;  %v2163_v6 = vld [vmem:[%s2032_s10 + $0x1c] sm:$0xf] }
  0x32   : > { %462 = vrot.lane.b32.xlu0 %v417_v29, %s1927_s21  ;;  %v1585_v44 = vcombine.low %v1503_v35, %v2036_v1  ;;  %v674_v46 = vsel %vm357_vm1, %v669_v33, %v673_v34  ;;  %v681_v47 = vor.u32 %v680_v39, %v676_v37  ;;  %v685_v48 = vrot.slane %v683_v5, 1  ;;  %v1511_v16 = vld [vmem:[%s2032_s10 + $0x24] sm:$0xf]  ;;  %v2183_v21 = vld [vmem:[%s2032_s10 + $0x50] ss:$0 sps:$4 sm:$0x11]  }
  0x33   : > { %v1581_v49 = vcombine.low %v1499_v43, %v2043_v4  ;;  %v626_v51 = vsel %vm357_vm1, %v621_v36, %v625_v17  ;;  %v633_v52 = vor.u32 %v632_v41, %v628_v40  ;;  %v637_v53 = vrot.slane %v635_v42, 1  ;;  %v2190_v27 = vld [vmem:[%s2032_s10 + $0x20] ss:$0 sps:$4 sm:$0x11]   ;;  %v201_v37 = vld [vmem:[%s2032_s10 + $0x48] sm:$0xf] }
  0x34   : > { %v763_v1 = vrot.slane %v1585_v44, 1  ;;  %v764_v54 = vrot.slane %v2109_v13, 1  ;;  %v1586_v58 = vcombine.low %v1504_v45, %v2096_v57  ;;  %v1582_v4 = vcombine.low %v1500_v50, %v2102_v63  ;;  %v1519_v63 = vld [vmem:[%s2032_s10 + $0x54] sm:$0xf]  ;;  %v2172_v13 = vld [vmem:[%s2032_s10 + $0x58] sm:$0xf] }
  0x35   : > { %585 = vrot.lane.b32.xlu1 %v1570_v12, %s1925_s11  ;;  %v686_v59 = vsel %vm357_vm1, %v681_v47, %v685_v48  ;;  %v638_v60 = vsel %vm357_vm1, %v633_v52, %v637_v53  ;;  %v751_v61 = vrot.slane %v1581_v49, 1  ;;  %v752_v62 = vrot.slane %v2114_v20, 1  ;;  %v2199_v34 = vld [vmem:[%s2032_s10 + $0x2c] ss:$0 sps:$4 sm:$0x11]  }
  0x36   : > { %577 = vrot.lane.b32.xlu0 %v1566_v19, %s1925_s11  ;;  %v1593_v0 = vcombine.low %v1517_v55, %v2152_v56  ;;  %v765_v57 = vsel %vm494_vm0, %v763_v1, %v764_v54  ;;  %v766_v7 = vrot.slane %v1586_v58, 1  ;;  %v767_v9 = vrot.slane %v2121_v24, 1  ;;  %v2178_v19 = vld [vmem:[%s2032_s10 + $0x28] sm:$0xf]  ;;  %v2204_v39 = vld [vmem:[%s2032_s10 + $0x4c] sm:$0xf] }
  0x37   : > { %v754_v10 = vrot.slane %v1582_v4, 1  ;;  %v755_v12 = vrot.slane %v2132_v11, 1  ;;  %v753_v14 = vsel %vm494_vm0, %v751_v61, %v752_v62  ;;  %v1589_v15 = vcombine.low %v1509_v3, %v2163_v6  ;;  %v2195_v11 = vld [vmem:[%s2032_s10 + $0x5c] ss:$0 sps:$4 sm:$0x11]  }
  0x38   : > { %v922_v20 = vshll.u32 %v1593_v0, 16  ;;  %v1594_v8 = vcombine.low %v1519_v63, %v2172_v13  ;;  %v768_v22 = vsel %vm494_vm0, %v766_v7, %v767_v9  ;;  %v1590_v24 = vcombine.low %v1511_v16, %v2178_v19  ;;  %v193_v17 = vld [vmem:[%s2032_s10 + $0x18] sm:$0xf]  ;;  %v2208_v40 = vld [vmem:[%s2032_s10 + $0x1c] sm:$0xf] }
  0x39   : > { %719 = vrot.lane.b32.xlu1 %v674_v46, %s1928_s24  ;;  %v756_v25 = vsel %vm494_vm0, %v754_v10, %v755_v12  ;;  %v874_v26 = vshll.u32 %v1589_v15, 16  ;;  %v920_v28 = vshrl.u32 %v1593_v0, 16  ;;  %v927_v32 = vshll.u32 %v2183_v21, 16  ;;  %v1537_v41 = vld [vmem:[%s2032_s10 + $0x48] sm:$0xe] }
  0x3a   : > { %711 = vrot.lane.b32.xlu0 %v626_v51, %s1928_s24  ;;  %v924_v29 = vrot.slane %v922_v20, 1  ;;  %v934_v30 = vshll.u32 %v1594_v8, 16  ;;  %v872_v2 = vshrl.u32 %v1589_v15, 16  ;;  %v886_v33 = vshll.u32 %v1590_v24, 16  ;;  %v1533_v46 = vld [vmem:[%s2032_s10 + $0x18] sm:$0xe] }
  0x3b   : > { %v876_v35 = vrot.slane %v874_v26, 1  ;;  %v879_v36 = vshll.u32 %v2190_v27, 16  ;;  %v929_v42 = vrot.slane %v927_v32, 1  ;;  %v932_v43 = vshrl.u32 %v1594_v8, 16  ;;  %v195_v9 = vld [vmem:[%s2032_s10 + $0x24] sm:$0xf] }
  0x3c   : > { %v925_v5 = vor.u32 %v924_v29, %v920_v28  ;;  %v936_v44 = vrot.slane %v934_v30, 1  ;;  %v939_v45 = vshll.u32 %v2195_v11, 16  ;;  %v884_v47 = vshrl.u32 %v1590_v24, 16  ;;  %v2226_v4 = vld [vmem:[%s2032_s10 + $0x50] ss:$0 sps:$4 sm:$0x11]  }
  0x3d   : > { %721 = vrot.lane.b32.xlu1 %v686_v59, %s1928_s24  ;;  %v888_v48 = vrot.slane %v886_v33, 1  ;;  %v891_v49 = vshll.u32 %v2199_v34, 16  ;;  %v2217_v50 = vcombine.low %v201_v37, %v2204_v39  ;;  %v877_v51 = vor.u32 %v876_v35, %v872_v2  ;;  %v2243_v10 = vld [vmem:[%s2032_s10 + $0x28] sm:$0xf]  ;;  %v1538_v12 = vld [vmem:[%s2032_s10 + $0x54] sm:$0xe] }
  0x3e   : > { %713 = vrot.lane.b32.xlu0 %v638_v60, %s1928_s24  ;;  %v881_v52 = vrot.slane %v879_v36, 1  ;;  %v2220_v53 = vcombine.low %v193_v17, %v2208_v40  ;;  %v1609_v1 = vcombine.low %v1537_v41, %v2152_v56  ;;  %v1605_v54 = vcombine.low %v1533_v46, %v2163_v6  ;;  %v2232_v56 = vld [vmem:[%s2032_s10 + $0x20] ss:$0 sps:$4 sm:$0x11]   ;;  %v203_v6 = vld [vmem:[%s2032_s10 + $0x54] sm:$0xf] }
  0x3f   : > { %v937_v55 = vor.u32 %v936_v44, %v932_v43  ;;  %v941_v58 = vrot.slane %v939_v45, 1  ;;  %v930_v59 = vsel %vm357_vm1, %v925_v5, %v929_v42  ;;  %v889_v60 = vor.u32 %v888_v48, %v884_v47  ;;  %v2268_v36 = vld [vmem:[%s2032_s10 + $0x5c] ss:$0 sps:$4 sm:$0x11]  }
  0x40   : > { %v893_v61 = vrot.slane %v891_v49, 1  ;;  %v433_v62 = vshll.u32 %v2217_v50, 16  ;;  %v385_v3 = vshll.u32 %v2220_v53, 16  ;;  %v1019_v63 = vrot.slane %v1609_v1, 1 }
  0x41   : > { %783 = vrot.lane.b32.xlu1 %v765_v57, %s1929_s27  ;;  %v2238_v57 = vld [vmem:[%s2032_s10 + $0x58] sm:$0xf]  ;;  %v1020_v7 = vrot.slane %v2183_v21, 1  ;;  %v1008_v16 = vrot.slane %v2190_v27, 1  ;;  %v438_v20 = vshll.u32 %v2226_v4, 16  ;;  %v383_v26 = vshrl.u32 %v2220_v53, 16 }
  0x42   : > { %775 = vrot.lane.b32.xlu0 %v753_v14, %s1929_s27  ;;  %v942_v14 = vsel %vm357_vm1, %v937_v55, %v941_v58  ;;  %v894_v21 = vsel %vm357_vm1, %v889_v60, %v893_v61  ;;  %v387_v28 = vrot.slane %v385_v3, 1  ;;  %v390_v27 = vshll.u32 %v2232_v56, 16 }
  0x43   : > { %v2260_v29 = vcombine.low %v195_v9, %v2243_v10  ;;  %v1610_v30 = vcombine.low %v1538_v12, %v2172_v13  ;;  %v440_v2 = vrot.slane %v438_v20, 1  ;;  %v1021_v33 = vsel %vm494_vm0, %v1019_v63, %v1020_v7  ;;  %v2273_v13 = vld [vmem:[%s2032_s10 + $0x2c] ss:$0 sps:$4 sm:$0x11]   ;;  %v216_v63 = vld [vmem:[%s2032_s10 + $0x24] sm:$0xe] }
  0x44   : > { %v388_v17 = vor.u32 %v387_v28, %v383_v26  ;;  %v392_v41 = vrot.slane %v390_v27, 1  ;;  %v1023_v43 = vrot.slane %v2195_v11, 1  ;;  %v1011_v45 = vrot.slane %v2199_v34, 1  ;;  %v215_v34 = vld [vmem:[%s2032_s10 + $0x18] sm:$0xe] }
  0x45   : > { %785 = vrot.lane.b32.xlu1 %v768_v22, %s1929_s27  ;;  %v431_v22 = vshrl.u32 %v2217_v50, 16  ;;  %v1022_v42 = vrot.slane %v1610_v30, 1  ;;  %v450_v49 = vshll.u32 %v2268_v36, 16  ;;  %v395_v1 = vshrl.u32 %v2260_v29, 16  ;;  %v1489_v28 = vld [vmem:[%s2032_s10 + $0x60] sm:$0xf] }
  0x46   : > { %777 = vrot.lane.b32.xlu0 %v756_v25, %s1929_s27  ;;  %v2255_v25 = vcombine.low %v203_v6, %v2238_v57  ;;  %v1559_v61 = vcombine.low %v215_v34, %v2208_v40  ;;  %v220_v6 = vld [vmem:[%s2032_s10 + $0x54] sm:$0xe]  ;;  %v514_v7 = vrot.slane %v2226_v4, 1  ;;  %v502_v9 = vrot.slane %v2232_v56, 1  ;;  %v1479_v56 = vld [vmem:[%s2032_s10 + $0x24] sm:$0xf] }
  0x47   : > { %v1024_v55 = vsel %vm494_vm0, %v1022_v42, %v1023_v43  ;;  %v1560_v4 = vcombine.low %v216_v63, %v2243_v10  ;;  %v2320_v10 = vld [vmem:[%s2032_s10 + $0x64] sm:$0xf]  ;;  %v2341_v42 = vld [vmem:[%s2032_s10 + $0x2c] ss:$0 sps:$4 sm:$0x11]  }
  0x48   : > { %v445_v37 = vshll.u32 %v2255_v25, 16  ;;  %v443_v47 = vshrl.u32 %v2255_v25, 16  ;;  %v501_v40 = vrot.slane %v1559_v61, 1  ;;  %v1829_v43 = vld [vmem:[%s2651_s1 + $0x8] sm:$0xff]   ;;  %v1830_v34 = vld [vmem:[%s2651_s1] sm:$0xff]  }
  0x49   : > { %839 = vrot.lane.b32.xlu1 %v1593_v0, %s1930_s28  ;;  %v882_v0 = vsel %vm357_vm1, %v877_v51, %v881_v52  ;;  %v219_v51 = vld [vmem:[%s2032_s10 + $0x48] sm:$0xe]  ;;  %v393_v52 = vsel %vm357_vm1, %v388_v17, %v392_v41  ;;  %v504_v30 = vrot.slane %v1560_v4, 1  ;;  %v2336_v41 = vld [vmem:[%s2032_s10 + $0x5c] ss:$0 sps:$4 sm:$0x11]  }
  0x4a   : > { %831 = vrot.lane.b32.xlu0 %v1589_v15, %s1930_s28  ;;  %v1007_v15 = vrot.slane %v1605_v54, 1  ;;  %v447_v48 = vrot.slane %v445_v37, 1  ;;  %v402_v54 = vshll.u32 %v2273_v13, 16  ;;  %v1563_v60 = vcombine.low %v219_v51, %v2204_v39  ;;  %v1828_v37 = vld [vmem:[%s2651_s1 + $0x10] ss:$0 sps:$4 sm:$0x33]  }
  0x4b   : > { %v503_v27 = vsel %vm494_vm0, %v501_v40, %v502_v9  ;;  %1673 = vmatprep.subr.msk.bf16.mxu0 %vm1227_vm2, %v1828_v37  ;;  %1674 = vmatprep.subr.msk.bf16.mxu1 %vm1227_vm2, %v1828_v37  ;;  %v1501_v9 = vld [vmem:[%s2032_s10 + $0x24] sm:$0xe] }
  0x4c   : > { %v1009_v5 = vsel %vm494_vm0, %v1007_v15, %v1008_v16  ;;  %v448_v58 = vor.u32 %v447_v48, %v443_v47  ;;  %v404_v3 = vrot.slane %v402_v54, 1  ;;  %v513_v12 = vrot.slane %v1563_v60, 1  ;;  %v1487_v15 = vld [vmem:[%s2032_s10 + $0x54] sm:$0xf]  ;;  %v2304_v16 = vld [vmem:[%s2032_s10 + $0x58] sm:$0xf] }
  0x4d   : > { %841 = vrot.lane.b32.xlu1 %v1594_v8, %s1930_s28  ;;  %v1534_v8 = vld [vmem:[%s2032_s10 + $0x24] sm:$0xe]  ;;  %v1229_v47 = vsel %vm1227_vm2, %v1828_v37, 0  ;;  %v695_v48 = vshll.u32 %v2336_v41, 16 }
  0x4e   : > { %833 = vrot.lane.b32.xlu0 %v1590_v24, %s1930_s28  ;;  %v435_v24 = vrot.slane %v433_v62, 1  ;;  %v1606_v32 = vcombine.low %v1534_v8, %v2178_v19  ;;  %v397_v19 = vshll.u32 %v2260_v29, 16  ;;  %v2310_v8 = vld [vmem:[%s2032_s10 + $0x28] sm:$0xf]  ;;  %1646 = vmatpush3.bf16.msra.mxu0 %v1229_v47 }
  0x4f   : > { %v1567_v26 = vcombine.low %v1479_v56, %v2310_v8  ;;  %v2354_v54 = vld [vmem:[%s2032_s10 + $0x38] ss:$0 sps:$4 sm:$0x11]   ;;  %1670 = vmatpush3.bf16.msra.mxu1 %v1229_v47  ;;  %1647 = vmatprep.subr.bf16.mxu0 %v1829_v43 }
  0x50   : > { %v436_v35 = vor.u32 %v435_v24, %v431_v22  ;;  %v1010_v44 = vrot.slane %v1606_v32, 1  ;;  %v399_v11 = vrot.slane %v397_v19, 1  ;;  %v517_v24 = vrot.slane %v2268_v36, 1  ;;  %1668 = vmatprep.subr.bf16.mxu1 %v1829_v43 }
  0x51   : > { %975 = vrot.lane.b32.xlu1 %v930_v59, %s1931_s29  ;;  %v452_v59 = vrot.slane %v450_v49, 1  ;;  %v505_v32 = vrot.slane %v2273_v13, 1  ;;  %v1572_v36 = vcombine.low %v1489_v28, %v2320_v10  ;;  %v642_v17 = vshll.u32 %v1567_v26, 16  ;;  %v2380_v28 = vld [vmem:[%s2032_s10 + $0x64] sm:$0xf] }
  0x52   : > { %967 = vrot.lane.b32.xlu0 %v882_v0, %s1931_s29  ;;  %v441_v46 = vsel %vm357_vm1, %v436_v35, %v440_v2  ;;  %v1012_v62 = vsel %vm494_vm0, %v1010_v44, %v1011_v45  ;;  %v400_v0 = vor.u32 %v399_v11, %v395_v1  ;;  %v1481_v2 = vld [vmem:[%s2032_s10 + $0x30] sm:$0xf]  ;;  %v640_v49 = vshrl.u32 %v1567_v26, 16  ;;  %1648 = vmatpush3.bf16.msra.mxu0 %v1829_v43 }
  0x53   : > { %v453_v39 = vsel %vm357_vm1, %v448_v58, %v452_v59  ;;  %v506_v13 = vsel %vm494_vm0, %v504_v30, %v505_v32  ;;  %v702_v44 = vshll.u32 %v1572_v36, 16  ;;  %v644_v51 = vrot.slane %v642_v17, 1  ;;  %1671 = vmatpush3.bf16.msra.mxu1 %v1829_v43  ;;  %1649 = vmatprep.subr.bf16.mxu0 %v1830_v34 }
  0x54   : > { %v405_v20 = vsel %vm357_vm1, %v400_v0, %v404_v3  ;;  %v647_v11 = vshll.u32 %v2341_v42, 16  ;;  %v700_v58 = vshrl.u32 %v1572_v36, 16  ;;  %v697_v59 = vrot.slane %v695_v48, 1  ;;  %v1505_v0 = vld [vmem:[%s2032_s10 + $0x54] sm:$0xe]  ;;  %1669 = vmatprep.subr.bf16.mxu1 %v1830_v34 }
  0x55   : > { %977 = vrot.lane.b32.xlu1 %v942_v14, %s1931_s29  ;;  %v1564_v14 = vcombine.low %v220_v6, %v2238_v57  ;;  %v515_v57 = vsel %vm494_vm0, %v513_v12, %v514_v7  ;;  %v645_v60 = vor.u32 %v644_v51, %v640_v49  ;;  %v704_v61 = vrot.slane %v702_v44, 1  ;;  %v1515_v44 = vld [vmem:[%s2032_s10 + $0x3c] sm:$0xf]  ;;  %v1824_v51 = vld [vmem:[%s2032_s10 + $0x68] ss:$0 sps:$4 sm:$0x11]  }
  0x56   : > { %969 = vrot.lane.b32.xlu0 %v894_v21, %s1931_s29  ;;  %v1571_v21 = vcombine.low %v1487_v15, %v2304_v16  ;;  %v649_v3 = vrot.slane %v647_v11, 1  ;;  %v659_v7 = vshll.u32 %v2354_v54, 16  ;;  %v1583_v15 = vcombine.low %v1501_v9, %v2310_v8  ;;  %1650 = vmatpush3.bf16.msra.mxu0 %v1830_v34  ;;  %v1825_v11 = vld [vmem:[%s2032_s10 + $0x38] ss:$0 sps:$4 sm:$0x11]  }
  0x57   : > { %v516_v22 = vrot.slane %v1564_v14, 1  ;;  %v705_v40 = vor.u32 %v704_v61, %v700_v58  ;;  %1672 = vmatpush3.bf16.msra.mxu1 %v1830_v34  ;;  %v770_v8 = vrot.slane %v2336_v41, 1  ;;  %v1523_v41 = vld [vmem:[%s2032_s10 + $0x6c] sm:$0xf]  ;;  %v761_v43 = vrot.slane %v2354_v54, 1 }
  0x58   : > { %v690_v35 = vshll.u32 %v1571_v21, 16  ;;  %v688_v45 = vshrl.u32 %v1571_v21, 16  ;;  %v650_v4 = vsel %vm357_vm1, %v645_v60, %v649_v3  ;;  %v757_v32 = vrot.slane %v1583_v15, 1  ;;  %v1826_v61 = vld [vmem:[%s2032_s10 + $0x74] ss:$0 sps:$4 sm:$0x11]  }
  0x59   : > { %1039 = vrot.lane.b32.xlu1 %v1021_v33, %s1932_s4  ;;  %v2326_v33 = vld [vmem:[%s2032_s10 + $0x34] sm:$0xf]  ;;  %v951_v58 = vshll.u32 %v1824_v51, 16  ;;  %v1827_v3 = vld [vmem:[%s2032_s10 + $0x44] ss:$0 sps:$4 sm:$0x11]  }
  0x5a   : > { %1031 = vrot.lane.b32.xlu0 %v1009_v5, %s1932_s4  ;;  %v518_v5 = vsel %vm494_vm0, %v516_v22, %v517_v24  ;;  %v1568_v19 = vcombine.low %v1481_v2, %v2326_v33  ;;  %v1513_v2 = vld [vmem:[%s2032_s10 + $0x30] sm:$0xf] }
  0x5c   : > { %v654_v1 = vshll.u32 %v1568_v19, 16  ;;  %v652_v6 = vshrl.u32 %v1568_v19, 16 }
  0x5d   : > { %466 = vrot.lane.b32.xlu1 %v441_v46, %s1927_s21  ;;  %v692_v46 = vrot.slane %v690_v35, 1  ;;  %v2387_v35 = vld [vmem:[%s2032_s10 + $0x34] sm:$0xf] }
  0x5e   : > { %458 = vrot.lane.b32.xlu0 %v393_v52, %s1927_s21  ;;  %v2350_v52 = vld [vmem:[%s2032_s10 + $0x68] ss:$0 sps:$4 sm:$0x11]   ;;  %v656_v63 = vrot.slane %v654_v1, 1  ;;  %v1591_v17 = vcombine.low %v1513_v2, %v2387_v35 }
  0x60   : > { %v657_v56 = vor.u32 %v656_v63, %v652_v6  ;;  %v898_v49 = vshll.u32 %v1591_v17, 16 }
  0x61   : > { %1041 = vrot.lane.b32.xlu1 %v1024_v55, %s1932_s4  ;;  %v693_v55 = vor.u32 %v692_v46, %v688_v45  ;;  %v2403_v45 = vld [vmem:[%s2032_s10 + $0x40] sm:$0xf] }
  0x62   : > { %1033 = vrot.lane.b32.xlu0 %v1012_v62, %s1932_s4  ;;  %v707_v62 = vshll.u32 %v2350_v52, 16  ;;  %v1592_v1 = vcombine.low %v1515_v44, %v2403_v45  ;;  %v900_v60 = vrot.slane %v898_v49, 1 }
  0x63   : > { %v698_v12 = vsel %vm357_vm1, %v693_v55, %v697_v59  ;;  %v896_v59 = vshrl.u32 %v1591_v17, 16 }
  0x64   : > { %v709_v14 = vrot.slane %v707_v62, 1  ;;  %v910_v62 = vshll.u32 %v1592_v1, 16  ;;  %v908_v15 = vshrl.u32 %v1592_v1, 16 }
  0x65   : > { %468 = vrot.lane.b32.xlu1 %v453_v39, %s1927_s21  ;;  %v1587_v39 = vcombine.low %v1505_v0, %v2304_v16  ;;  %v1502_v16 = vld [vmem:[%s2032_s10 + $0x30] sm:$0xe]  ;;  %v903_v0 = vshll.u32 %v1825_v11, 16  ;;  %v901_v9 = vor.u32 %v900_v60, %v896_v59 }
  0x66   : > { %460 = vrot.lane.b32.xlu0 %v405_v20, %s1927_s21  ;;  %v1506_v20 = vld [vmem:[%s2032_s10 + $0x60] sm:$0xe]  ;;  %v710_v22 = vsel %vm357_vm1, %v705_v40, %v709_v14 }
  0x67   : > { %v769_v24 = vrot.slane %v1587_v39, 1  ;;  %v1539_v40 = vld [vmem:[%s2032_s10 + $0x60] sm:$0xe]  ;;  %v905_v14 = vrot.slane %v903_v0, 1 }
  0x69   : > { %531 = vrot.lane.b32.xlu1 %v515_v57, %s1926_s20  ;;  %v1588_v57 = vcombine.low %v1506_v20, %v2320_v10  ;;  %v758_v10 = vrot.slane %v2341_v42, 1  ;;  %v771_v37 = vsel %vm494_vm0, %v769_v24, %v770_v8  ;;  %v912_v20 = vrot.slane %v910_v62, 1  ;;  %v1540_v8 = vld [vmem:[%s2032_s10 + $0x6c] sm:$0xe] }
  0x6a   : > { %523 = vrot.lane.b32.xlu0 %v503_v27, %s1926_s20  ;;  %v1584_v27 = vcombine.low %v1502_v16, %v2326_v33  ;;  %v773_v33 = vrot.slane %v2350_v52, 1 }
  0x6c   : > { %v760_v42 = vrot.slane %v1584_v27, 1 }
  0x6d   : > { %533 = vrot.lane.b32.xlu1 %v518_v5, %s1926_s20  ;;  %v772_v5 = vrot.slane %v1588_v57, 1 }
  0x6e   : > { %525 = vrot.lane.b32.xlu0 %v506_v13, %s1926_s20  ;;  %v2397_v13 = vld [vmem:[%s2032_s10 + $0x70] sm:$0xf]  ;;  %v762_v52 = vsel %vm494_vm0, %v760_v42, %v761_v43  ;;  %v1029_v43 = vrot.slane %v1826_v61, 1 }
  0x6f   : > { %v1596_v47 = vcombine.low %v1523_v41, %v2397_v13  ;;  %v774_v48 = vsel %vm494_vm0, %v772_v5, %v773_v33  ;;  %v1026_v5 = vrot.slane %v1824_v51, 1  ;;  %v1014_v41 = vrot.slane %v1825_v11, 1 }
  0x71   : > { %587 = vrot.lane.b32.xlu1 %v1571_v21, %s1925_s11  ;;  %v661_v21 = vrot.slane %v659_v7, 1  ;;  %v958_v54 = vshll.u32 %v1596_v47, 16  ;;  %v956_v63 = vshrl.u32 %v1596_v47, 16  ;;  %v953_v7 = vrot.slane %v951_v58, 1 }
  0x72   : > { %579 = vrot.lane.b32.xlu0 %v1567_v26, %s1925_s11  ;;  %v1521_v26 = vld [vmem:[%s2032_s10 + $0x60] sm:$0xf] }
  0x73   : > { %v662_v30 = vsel %vm357_vm1, %v657_v56, %v661_v21  ;;  %v960_v39 = vrot.slane %v958_v54, 1  ;;  %v1535_v56 = vld [vmem:[%s2032_s10 + $0x30] sm:$0xe]  ;;  %v1611_v21 = vcombine.low %v1539_v40, %v2380_v28 }
  0x74   : > { %v1607_v24 = vcombine.low %v1535_v56, %v2387_v35 }
  0x75   : > { %589 = vrot.lane.b32.xlu1 %v1572_v36, %s1925_s11  ;;  %v1595_v36 = vcombine.low %v1521_v26, %v2380_v28  ;;  %v961_v57 = vor.u32 %v960_v39, %v956_v63  ;;  %v906_v26 = vsel %vm357_vm1, %v901_v9, %v905_v14  ;;  %v1612_v28 = vcombine.low %v1540_v8, %v2397_v13 }
  0x76   : > { %581 = vrot.lane.b32.xlu0 %v1568_v19, %s1925_s11  ;;  %v759_v19 = vsel %vm494_vm0, %v757_v32, %v758_v10  ;;  %v1536_v10 = vld [vmem:[%s2032_s10 + $0x3c] sm:$0xe]  ;;  %s175_s10 = sand.u32 1, %s1899_s13   ;;  %s1933_s11 = smov [#allocation2]  }
  0x77   : > { %v946_v46 = vshll.u32 %v1595_v36, 16  ;;  %v944_v34 = vshrl.u32 %v1595_v36, 16  ;;  %v1608_v35 = vcombine.low %v1536_v10, %v2403_v45  ;;  %v1028_v13 = vrot.slane %v1612_v28, 1  ;;  %s2598_s9 = scalar_lea.sflag [#allocation3], %s175_s10 }
  0x79   : > { %723 = vrot.lane.b32.xlu1 %v698_v12, %s1928_s24  ;;  %v948_v55 = vrot.slane %v946_v46, 1  ;;  %v963_v12 = vshll.u32 %v1826_v61, 16  ;;  %v1030_v49 = vsel %vm494_vm0, %v1028_v13, %v1029_v43 }
  0x7a   : > { %715 = vrot.lane.b32.xlu0 %v650_v4, %s1928_s24  ;;  %v915_v4 = vshll.u32 %v1827_v3, 16 }
  0x7b   : > { %v949_v6 = vor.u32 %v948_v55, %v944_v34 }
  0x7c   : > { %v917_v32 = vrot.slane %v915_v4, 1 }
  0x7d   : > { %725 = vrot.lane.b32.xlu1 %v710_v22, %s1928_s24  ;;  %v954_v16 = vsel %vm357_vm1, %v949_v6, %v953_v7  ;;  %v965_v22 = vrot.slane %v963_v12, 1 }
  0x7e   : > { %717 = vrot.lane.b32.xlu0 %v662_v30, %s1928_s24  ;;  %v913_v30 = vor.u32 %v912_v20, %v908_v15  ;;  %s1835_s24 = sshll.u32 %s1933_s11, 4  ;;  %s1836_s24 = int_to_ptr.vmem [resolvable:$false] %s1835_s24 }
  0x80   : > { %v918_v33 = vsel %vm357_vm1, %v913_v30, %v917_v32 }
  0x81   : > { %787 = vrot.lane.b32.xlu1 %v771_v37, %s1929_s27  ;;  %v1025_v37 = vrot.slane %v1611_v21, 1 }
  0x82   : > { %779 = vrot.lane.b32.xlu0 %v759_v19, %s1929_s27 }
  0x83   : > { %v1027_v42 = vsel %vm494_vm0, %v1025_v37, %v1026_v5 }
  0x85   : > { %789 = vrot.lane.b32.xlu1 %v774_v48, %s1929_s27  ;;  %v1017_v48 = vrot.slane %v1827_v3, 1 }
  0x86   : > { %781 = vrot.lane.b32.xlu0 %v762_v52, %s1929_s27  ;;  %s1468_s27 = sshll.u32 %s175_s10, 7 }
  0x89   : > { %843 = vrot.lane.b32.xlu1 %v1595_v36, %s1930_s28  ;;  %v966_v36 = vsel %vm357_vm1, %v961_v57, %v965_v22 }
  0x8a   : > { %835 = vrot.lane.b32.xlu0 %v1591_v17, %s1930_s28  ;;  %v1013_v17 = vrot.slane %v1607_v24, 1 }
  0x8c   : > { %v1015_v46 = vsel %vm494_vm0, %v1013_v17, %v1014_v41 }
  0x8d   : > { %845 = vrot.lane.b32.xlu1 %v1596_v47, %s1930_s28  ;;  %v1016_v47 = vrot.slane %v1608_v35, 1 }
  0x8e   : > { %837 = vrot.lane.b32.xlu0 %v1592_v1, %s1930_s28  ;;  %s2540_s28 = scalar_lea.vmem [#allocation2], %s1468_s27  ;;  %s1837_s27 = scalar_lea.vmem %s1836_s24, 4096 }
  0x8f   : > { %v1018_v51 = vsel %vm494_vm0, %v1016_v47, %v1017_v48 }
  0x91   : > { %v2428_v27 = vpop.permute.xlu1 %583  ;;  %979 = vrot.lane.b32.xlu1 %v954_v16, %s1931_s29 }
  0x92   : > { %v576_v2 = vpop.permute.xlu0 %575  ;;  %971 = vrot.lane.b32.xlu0 %v906_v26, %s1931_s29 }
  0x95   : > { %981 = vrot.lane.b32.xlu1 %v966_v36, %s1931_s29 }
  0x96   : > { %v528_v19 = vpop.permute.xlu1 %527  ;;  %973 = vrot.lane.b32.xlu0 %v918_v33, %s1931_s29  ;;  %s1633_s29 = sshll.u32 %s1907_s15, 4 }
  0x97   : > { %v520_v44 = vpop.permute.xlu0 %519 }
  0x99   : > { %1043 = vrot.lane.b32.xlu1 %v1027_v42, %s1932_s4 }
  0x9a   : > { %v530_v45 = vpop.permute.xlu1 %529  ;;  %1035 = vrot.lane.b32.xlu0 %v1015_v46, %s1932_s4 }
  0x9c   : > { %v522_v52 = vpop.permute.xlu0 %521 }
  0x9d   : > { %1045 = vrot.lane.b32.xlu1 %v1030_v49, %s1932_s4 }
  0x9e   : > { %1037 = vrot.lane.b32.xlu0 %v1018_v51, %s1932_s4  ;;  %s1628_s4 = sshll.u32 %s1911_s16, 5  ;;  %s1377_s16 = sshll.u32 %s2540_s28, 4  ;;  %s2590_s16 = int_to_ptr.vmem [resolvable:$true] %s1377_s16 }
  0x9f   : > { %v457_v1 = vpop.permute.xlu1 %456  ;;  %s1374_s5 = sadd.s32 %s1633_s29, %s1628_s4  ;;  %s1831_s21 = scalar_lea.vmem %s2590_s16, 2048 }
  0xa0   : > { %v455_v11 = vpop.permute.xlu0 %454  ;;  %s1629_s15 = sshll.u32 %s1374_s5, 7  ;;  %p1832_p13 = scmp.ne.s32.totalorder %s2590_s16, %s1831_s21 }
  0xa1   : > { %v1049_v14 = vsel %vm1047_vm3, %v2069_v23, %v455_v11  ;;  %s2586_s8 = scalar_lea.hbm %s2653_s3, %s1629_s15  ;;  %p1838_p2 = scmp.lt.s32.totalorder %s2590_s16, %s1836_s24 }
  0xa2   : > { %v1066_v56 = vsel %vm1064_vm4, %v1049_v14, %v520_v44  ;;  %p1833_p0 = pnand %p1832_p13, %p2006_p3  ;;  %p1839_p4 = scmp.lt.s32.totalorder %s1837_s27, %s1831_s21 }
  0xa3   : > { %v465_v54 = vpop.permute.xlu1 %464  ;;  %v1083_v57 = vsel %vm1081_vm5, %v1066_v56, %v576_v2  ;;  %v1051_v2 = vsel %vm1047_vm3, %v2082_v38, %v457_v1 }
  0xa4   : > { %v463_v34 = vpop.permute.xlu0 %462  ;;  %v1068_v33 = vsel %vm1064_vm4, %v1051_v2, %v522_v52  ;;  %p1834_p1 = pneg %p1833_p0  ;;  %p1840_p5 = por %p1839_p4, %p1838_p2 }
  0xa5   : > { %v1057_v40 = vsel %vm1047_vm3, %v2064_v18, %v463_v34 }
  0xa6   : > { %v1074_v20 = vsel %vm1064_vm4, %v1057_v40, %v528_v19  ;;  %p1841_p6 = pnand %p1840_p5, %p1834_p1 }
  0xa7   : > { %v586_v55 = vpop.permute.xlu1 %585  ;;  %v1091_v21 = vsel %vm1081_vm5, %v1074_v20, %v2428_v27  ;;  %v1059_v27 = vsel %vm1047_vm3, %v2076_v31, %v465_v54 }
  0xa8   : > { %v578_v58 = vpop.permute.xlu0 %577  ;;  %v1076_v35 = vsel %vm1064_vm4, %v1059_v27, %v530_v45 }
  0xa9   : > { %v1093_v31 = vsel %vm1081_vm5, %v1076_v35, %v586_v55  ;;  %v1085_v38 = vsel %vm1081_vm5, %v1068_v33, %v578_v58 }
  0xab   : > { %v720_v59 = vpop.permute.xlu1 %719 }
  0xac   : > { %v712_v60 = vpop.permute.xlu0 %711  ;;  %v1108_v18 = vsel %vm1098_vm6, %v1091_v21, %v720_v59 }
  0xad   : > { %v1100_v22 = vsel %vm1098_vm6, %v1083_v57, %v712_v60 }
  0xaf   : > { %v722_v61 = vpop.permute.xlu1 %721 }
  0xb0   : > { %v714_v62 = vpop.permute.xlu0 %713  ;;  %v1110_v41 = vsel %vm1098_vm6, %v1093_v31, %v722_v61 }
  0xb1   : > { %v1102_v42 = vsel %vm1098_vm6, %v1085_v38, %v714_v62 }
  0xb3   : > { %v784_v0 = vpop.permute.xlu1 %783 }
  0xb4   : > { %v776_v3 = vpop.permute.xlu0 %775  ;;  %v1125_v24 = vsel %vm1115_vm7, %v1108_v18, %v784_v0 }
  0xb5   : > { %v1117_v8 = vsel %vm1115_vm7, %v1100_v22, %v776_v3 }
  0xb7   : > { %v786_v6 = vpop.permute.xlu1 %785 }
  0xb8   : > { %v778_v63 = vpop.permute.xlu0 %777  ;;  %v1127_v13 = vsel %vm1115_vm7, %v1110_v41, %v786_v6 }
  0xb9   : > { %v1119_v43 = vsel %vm1115_vm7, %v1102_v42, %v778_v63 }
  0xbb   : > { %v840_v7 = vpop.permute.xlu1 %839 }
  0xbc   : > { %v832_v9 = vpop.permute.xlu0 %831  ;;  %v1142_v26 = vsel %vm1132_vm8, %v1125_v24, %v840_v7 }
  0xbd   : > { %v1134_v30 = vsel %vm1132_vm8, %v1117_v8, %v832_v9 }
  0xbf   : > { %v842_v39 = vpop.permute.xlu1 %841 }
  0xc0   : > { %v834_v12 = vpop.permute.xlu0 %833  ;;  %v1144_v44 = vsel %vm1132_vm8, %v1127_v13, %v842_v39 }
  0xc1   : > { %v1136_v46 = vsel %vm1132_vm8, %v1119_v43, %v834_v12 }
  0xc3   : > { %v976_v15 = vpop.permute.xlu1 %975 }
  0xc4   : > { %v968_v4 = vpop.permute.xlu0 %967  ;;  %v1159_v32 = vsel %vm1149_vm9, %v1142_v26, %v976_v15 }
  0xc5   : > { %v1151_v28 = vsel %vm1149_vm9, %v1134_v30, %v968_v4 }
  0xc7   : > { %v978_v16 = vpop.permute.xlu1 %977 }
  0xc8   : > { %v970_v23 = vpop.permute.xlu0 %969  ;;  %v1161_v47 = vsel %vm1149_vm9, %v1144_v44, %v978_v16 }
  0xc9   : > { %v1153_v45 = vsel %vm1149_vm9, %v1136_v46, %v970_v23 }
  0xcb   : > { %v1040_v10 = vpop.permute.xlu1 %1039 }
  0xcc   : > { %v1032_v36 = vpop.permute.xlu0 %1031  ;;  %v1176_v37 = vsel %vm1166_vm10, %v1159_v32, %v1040_v10 }
  0xcd   : > { %v1168_v5 = vsel %vm1166_vm10, %v1151_v28, %v1032_v36  ;;  %1659 = vmatprep.mubr.msk.bf16.mxu1 %vm1210_vm11, %v1176_v37 }
  0xce   : > { %1651 = vmatprep.mubr.msk.bf16.mxu0 %vm1210_vm11, %v1168_v5 }
  0xcf   : > { %v467_v17 = vpop.permute.xlu1 %466 }
  0xd0   : > { %v459_v19 = vpop.permute.xlu0 %458  ;;  %v1061_v54 = vsel %vm1047_vm3, %v2217_v50, %v467_v17 }
  0xd1   : > { %v1053_v55 = vsel %vm1047_vm3, %v2220_v53, %v459_v19 }
  0xd3   : > { %v1042_v48 = vpop.permute.xlu1 %1041 }
  0xd4   : > { %v1178_v49 = vsel %vm1166_vm10, %v1161_v47, %v1042_v48  ;;  %v1034_v51 = vpop.permute.xlu0 %1033 }
  0xd5   : > { %v1170_v52 = vsel %vm1166_vm10, %v1153_v45, %v1034_v51  ;;  %1660 = vmatmul.mubr.msk.bf16.vlgmr.msra.gmra.mxu1 %vm1210_vm11, %v1178_v49  ;;  %v2532_v51 = vld [vmem:[%s2652_s2] ss:$0 sm:$0xff] }
  0xd6   : > { %1652 = vmatmul.mubr.msk.bf16.vlgmr.msra.gmra.mxu0 %vm1210_vm11, %v1170_v52 }
  0xd7   : > { %v469_v1 = vpop.permute.xlu1 %468 }
  0xd8   : > { %v461_v11 = vpop.permute.xlu0 %460  ;;  %v1063_v61 = vsel %vm1047_vm3, %v2255_v25, %v469_v1 }
  0xd9   : > { %v1055_v0 = vsel %vm1047_vm3, %v2260_v29, %v461_v11 }
  0xdb   : > { %v532_v34 = vpop.permute.xlu1 %531 }
  0xdc   : > { %v1078_v58 = vsel %vm1064_vm4, %v1061_v54, %v532_v34  ;;  %v524_v59 = vpop.permute.xlu0 %523 }
  0xdd   : > { %v1070_v60 = vsel %vm1064_vm4, %v1053_v55, %v524_v59 }
  0xdf   : > { %v534_v62 = vpop.permute.xlu1 %533 }
  0xe0   : > { %v1080_v3 = vsel %vm1064_vm4, %v1063_v61, %v534_v62  ;;  %v526_v6 = vpop.permute.xlu0 %525 }
  0xe1   : > { %v1072_v50 = vsel %vm1064_vm4, %v1055_v0, %v526_v6 }
  0xe3   : > { %v588_v63 = vpop.permute.xlu1 %587 }
  0xe4   : > { %v580_v7 = vpop.permute.xlu0 %579  ;;  %v1095_v23 = vsel %vm1081_vm5, %v1078_v58, %v588_v63 }
  0xe5   : > { %v1087_v24 = vsel %vm1081_vm5, %v1070_v60, %v580_v7 }
  0xe7   : > { %v590_v53 = vpop.permute.xlu1 %589 }
  0xe8   : > { %v582_v9 = vpop.permute.xlu0 %581  ;;  %v1097_v2 = vsel %vm1081_vm5, %v1080_v3, %v590_v53 }
  0xe9   : > { %v1089_v5 = vsel %vm1081_vm5, %v1072_v50, %v582_v9 }
  0xeb   : > { %v724_v39 = vpop.permute.xlu1 %723 }
  0xec   : > { %v716_v12 = vpop.permute.xlu0 %715  ;;  %v1112_v8 = vsel %vm1098_vm6, %v1095_v23, %v724_v39 }
  0xed   : > { %v1104_v27 = vsel %vm1098_vm6, %v1087_v24, %v716_v12 }
  0xef   : > { %v726_v40 = vpop.permute.xlu1 %725 }
  0xf0   : > { %v718_v14 = vpop.permute.xlu0 %717  ;;  %v1114_v35 = vsel %vm1098_vm6, %v1097_v2, %v726_v40 }
  0xf1   : > { %v1106_v38 = vsel %vm1098_vm6, %v1089_v5, %v718_v14 }
  0xf3   : > { %v788_v15 = vpop.permute.xlu1 %787 }
  0xf4   : > { %v780_v20 = vpop.permute.xlu0 %779  ;;  %v1129_v30 = vsel %vm1115_vm7, %v1112_v8, %v788_v15 }
  0xf5   : > { %v1121_v32 = vsel %vm1115_vm7, %v1104_v27, %v780_v20 }
  0xf7   : > { %v790_v25 = vpop.permute.xlu1 %789 }
  0xf8   : > { %v782_v4 = vpop.permute.xlu0 %781  ;;  %v1131_v41 = vsel %vm1115_vm7, %v1114_v35, %v790_v25 }
  0xf9   : > { %v1123_v42 = vsel %vm1115_vm7, %v1106_v38, %v782_v4 }
  0xfb   : > { %v844_v56 = vpop.permute.xlu1 %843 }
  0xfc   : > { %v836_v21 = vpop.permute.xlu0 %835  ;;  %v1146_v10 = vsel %vm1132_vm8, %v1129_v30, %v844_v56 }
  0xfd   : > { %v1138_v28 = vsel %vm1132_vm8, %v1121_v32, %v836_v21 }
  0xff   : > { %v846_v29 = vpop.permute.xlu1 %845 }
 0x100   : > { %v838_v16 = vpop.permute.xlu0 %837  ;;  %v1148_v13 = vsel %vm1132_vm8, %v1131_v41, %v846_v29 }
 0x101   : > { %v1140_v43 = vsel %vm1132_vm8, %v1123_v42, %v838_v16 }
 0x103   : > { %v980_v18 = vpop.permute.xlu1 %979 }
 0x104   : > { %v972_v57 = vpop.permute.xlu0 %971  ;;  %v1163_v36 = vsel %vm1149_vm9, %v1146_v10, %v980_v18 }
 0x105   : > { %v1155_v31 = vsel %vm1149_vm9, %v1138_v28, %v972_v57 }
 0x107   : > { %v982_v22 = vpop.permute.xlu1 %981 }
 0x108   : > { %v974_v26 = vpop.permute.xlu0 %973  ;;  %v1165_v44 = vsel %vm1149_vm9, %v1148_v13, %v982_v22 }
 0x109   : > { %v1157_v47 = vsel %vm1149_vm9, %v1140_v43, %v974_v26 }
 0x10b   : > { %v1044_v37 = vpop.permute.xlu1 %1043 }
 0x10c   : > { %v1180_v33 = vsel %vm1166_vm10, %v1163_v36, %v1044_v37  ;;  %v1036_v17 = vpop.permute.xlu0 %1035 }
 0x10d   : > { %v1172_v19 = vsel %vm1166_vm10, %v1155_v31, %v1036_v17  ;;  %1663 = vmatprep.mubr.msk.bf16.mxu1 %vm1210_vm11, %v1180_v33 }
 0x10e   : > { %1655 = vmatprep.mubr.msk.bf16.mxu0 %vm1210_vm11, %v1172_v19 }
 0x10f   : > { %v1046_v46 = vpop.permute.xlu1 %1045 }
 0x110   : > { %v1182_v48 = vsel %vm1166_vm10, %v1165_v44, %v1046_v46  ;;  %v1038_v45 = vpop.permute.xlu0 %1037 }
 0x111   : > { %v1174_v49 = vsel %vm1166_vm10, %v1157_v47, %v1038_v45  ;;  %1664 = vmatmul.mubr.msk.bf16.gmra.mxu1 %vm1210_vm11, %v1182_v48 }
 0x112   : > { %1656 = vmatmul.mubr.msk.bf16.gmra.mxu0 %vm1210_vm11, %v1174_v49 }
 0x195   : > { %v1661_v52 = vpop.f32.mrf.mxu1 }
 0x196   : > { %v1653_v1 = vpop.f32.mrf.mxu0  ;;  %v1306_v11 = vadd.f32 %v1661_v52, %v2532_v51 }
 0x197   : > { %v1274_v54 = vadd.f32 %v1653_v1, %v2532_v51  ;;  %v1297_v34 = vpop.f32.mrf.mxu1 }
 0x198   : > { %v1338_v55 = vmax.f32 %v1306_v11, 0.0  ;;  %v1265_v58 = vpop.f32.mrf.mxu0  ;;  %v1298_v59 = vadd.f32 %v2532_v51, %v1297_v34 }
 0x199   : > { %v1330_v60 = vmax.f32 %v1274_v54, 0.0  ;;  %v1266_v61 = vadd.f32 %v2532_v51, %v1265_v58  ;;  %v1662_v62 = vpop.f32.mrf.mxu1 }
 0x19a   : > { %1354 = vst.msk [vmem:[%s2540_s28 + $0x50] sm:$0xff] %vm1166_vm10, %v1338_v55  ;;  %v1336_v0 = vmax.f32 %v1298_v59, 0.0  ;;  %v1654_v3 = vpop.f32.mrf.mxu0  ;;  %v1309_v6 = vadd.f32 %v1662_v62, %v2532_v51 }
 0x19b   : > { %1346 = vst.msk [vmem:[%s2540_s28 + $0x10] sm:$0xff] %vm1166_vm10, %v1330_v60  ;;  %v1328_v50 = vmax.f32 %v1266_v61, 0.0  ;;  %v1277_v63 = vadd.f32 %v1654_v3, %v2532_v51  ;;  %v1300_v7 = vpop.f32.mrf.mxu1 }
 0x19c   : > { %1352 = vst.msk [vmem:[%s2540_s28 + $0x40] sm:$0xff] %vm1166_vm10, %v1336_v0  ;;  %v1339_v53 = vmax.f32 %v1309_v6, 0.0  ;;  %v1268_v9 = vpop.f32.mrf.mxu0  ;;  %v1301_v39 = vadd.f32 %v2532_v51, %v1300_v7 }
 0x19d   : > { %1344 = vst.msk [vmem:[%s2540_s28] sm:$0xff] %vm1166_vm10, %v1328_v50  ;;  %v1331_v12 = vmax.f32 %v1277_v63, 0.0  ;;  %v1269_v40 = vadd.f32 %v2532_v51, %v1268_v9 }
 0x19e   : > { %1355 = vst.msk [vmem:[%s2540_s28 + $0x58] sm:$0xff] %vm1166_vm10, %v1339_v53  ;;  %v1337_v14 = vmax.f32 %v1301_v39, 0.0 }
 0x19f   : > { %1347 = vst.msk [vmem:[%s2540_s28 + $0x18] sm:$0xff] %vm1166_vm10, %v1331_v12  ;;  %v1329_v15 = vmax.f32 %v1269_v40, 0.0 }
 0x1a0   : > { %1353 = vst.msk [vmem:[%s2540_s28 + $0x48] sm:$0xff] %vm1166_vm10, %v1337_v14 }
 0x1a1   : > { %1345 = vst.msk [vmem:[%s2540_s28 + $0x8] sm:$0xff] %vm1166_vm10, %v1329_v15 }
 0x1d1   : > { %v1665_v20 = vpop.f32.mrf.mxu1 }
 0x1d2   : > { %v1657_v25 = vpop.f32.mrf.mxu0  ;;  %v1322_v4 = vadd.f32 %v1665_v20, %v2532_v51 }
 0x1d3   : > { %v1290_v56 = vadd.f32 %v1657_v25, %v2532_v51  ;;  %v1313_v21 = vpop.f32.mrf.mxu1 }
 0x1d4   : > { %v1342_v29 = vmax.f32 %v1322_v4, 0.0  ;;  %v1281_v16 = vpop.f32.mrf.mxu0  ;;  %v1314_v18 = vadd.f32 %v2532_v51, %v1313_v21 }
 0x1d5   : > { %v1334_v57 = vmax.f32 %v1290_v56, 0.0  ;;  %v1282_v23 = vadd.f32 %v2532_v51, %v1281_v16  ;;  %v1666_v22 = vpop.f32.mrf.mxu1 }
 0x1d6   : > { %1358 = vst.msk [vmem:[%s2540_s28 + $0x70] sm:$0xff] %vm1166_vm10, %v1342_v29  ;;  %v1340_v24 = vmax.f32 %v1314_v18, 0.0  ;;  %v1658_v8 = vpop.f32.mrf.mxu0  ;;  %v1325_v26 = vadd.f32 %v1666_v22, %v2532_v51 }
 0x1d7   : > { %1350 = vst.msk [vmem:[%s2540_s28 + $0x30] sm:$0xff] %vm1166_vm10, %v1334_v57  ;;  %v1332_v27 = vmax.f32 %v1282_v23, 0.0  ;;  %v1293_v30 = vadd.f32 %v1658_v8, %v2532_v51  ;;  %v1316_v32 = vpop.f32.mrf.mxu1 }
 0x1d8   : > { %1356 = vst.msk [vmem:[%s2540_s28 + $0x60] sm:$0xff] %vm1166_vm10, %v1340_v24  ;;  %v1343_v10 = vmax.f32 %v1325_v26, 0.0  ;;  %v1284_v2 = vpop.f32.mrf.mxu0  ;;  %v1317_v28 = vadd.f32 %v2532_v51, %v1316_v32 }
 0x1d9   : > { %1348 = vst.msk [vmem:[%s2540_s28 + $0x20] sm:$0xff] %vm1166_vm10, %v1332_v27  ;;  %v1335_v36 = vmax.f32 %v1293_v30, 0.0  ;;  %v1285_v37 = vadd.f32 %v2532_v51, %v1284_v2 }
 0x1da   : > { %1359 = vst.msk [vmem:[%s2540_s28 + $0x78] sm:$0xff] %vm1166_vm10, %v1343_v10  ;;  %v1341_v5 = vmax.f32 %v1317_v28, 0.0 }
 0x1db   : > { %1351 = vst.msk [vmem:[%s2540_s28 + $0x38] sm:$0xff] %vm1166_vm10, %v1335_v36  ;;  %v1333_v35 = vmax.f32 %v1285_v37, 0.0 }
 0x1dc   : > { %1357 = vst.msk [vmem:[%s2540_s28 + $0x68] sm:$0xff] %vm1166_vm10, %v1341_v5 }
 0x1dd   : > { %1349 = vst.msk [vmem:[%s2540_s28 + $0x28] sm:$0xff] %vm1166_vm10, %v1333_v35 }
 0x1de   : > { %1844 = shalt.err (!%p1841_p6)
}
 0x1df   : > { %s1845_s10 = scalar_lea.hbm %s2586_s8, 2048  ;;  %s1849_s4 = scalar_lea.hbm %s2653_s3, 8192 }
 0x1e0   : > { %p1846_p7 = scmp.ne.s32.totalorder %s2586_s8, %s1845_s10  ;;  %p1850_p11 = scmp.lt.s32.totalorder %s2586_s8, %s2653_s3 }
 0x1e1   : > { %p1851_p12 = scmp.lt.s32.totalorder %s1849_s4, %s1845_s10 }
 0x1e2   : > { %p1847_p9 = pnand %p1846_p7, %p2006_p3 }
 0x1e3   : > { %p1852_p13 = por %p1851_p12, %p1850_p11 }
 0x1e4   : > { %p1848_p10 = pneg %p1847_p9 }
 0x1e6   : > { %p1853_p0 = pnand %p1852_p13, %p1848_p10 }
 0x1e8   : > { %1856 = shalt.err (!%p1853_p0)
}
 0x1e9   : > { %s1934_s6 = smov 128  }
 0x1ea   : > { %1676 = dma.vmem_to_hbm [thread:$0]  (%p2006_p3), %s2590_s16, 2048, %s2586_s8, %s2598_s9, %s1934_s6, %s1934_s6, %s1926_s20  }
 0x1eb PF: > { %p1682_p1 = scmp.ge.s32.totalorder %s1923_s19, 2  ;;  %s1392_s7 = sand.u32 1, %s1895_s12  }
 0x1ec   : > { %s1393_s21 = scalar_lea.sflag [#allocation3], %s1392_s7 }
 0x1ed   : > { %p1679_p2 = pnand %p1682_p1, %p2015_p8 }
 0x1ef   : > { %p1680_p4 = pneg %p1679_p2 }
 0x1f1   : > { %1890 = dma.done.wait (%p1680_p4), %s1393_s21, 2048  }
 0x1f2   : > { %1892 = vsyncadd (%p1680_p4), %s1393_s21, 4294965248  ;;  %s16_s19 = sadd.s32 1, %s1923_s19   ;;  %s2656_s12 = smov %s1899_s13 }
 0x1f3   : > { %p13_p5 = scmp.ge.s32.totalorder %s16_s19, 6   ;;  %s2657_s13 = smov %s1903_s14 }
 0x1f4   : > { %s2658_s14 = smov %s2024_s30  ;;  %s2659_s15 = smov %s1915_s17 }
 0x1f5   : > { %s2660_s16 = smov %s1919_s18  ;;  %s2661_s17 = smov %s2664_s22 }
 0x1f6   : > { %s2662_s18 = smov %s2668_s23  ;;  %15 = sbr.rel (!%p13_p5) target bundleno = 5 (0x5), region = 70 }
 0x1fb   :  { %1398 = vsyncpa [#allocation3], 1 }
 0x1fc   :  { %1400 = vsyncpa [#allocation3 + $0x1], 1 }

</bundles_post_ra>
